<compile_context>
chip_gen: v6e
topology: v6e:2x2x1
jax: 0.10.0
libtpu: 0.0.40
codegen_flags: <defaults>
</compile_context>

<pallas_src>
import jax
import jax.numpy as jnp
from jax.experimental import pallas as pl
from jax.experimental.pallas import tpu as pltpu

C_MID = 128                          # fixed by the module: 128 mid channels
_MAX_TILE_PIXELS = 16384             # review: 8192-16384 sweet spot
_MAX_BATCH_PACK = 8                  # review: pack 4-8 images for tiny HW
_VMEM_LIMIT_BYTES = 32 * 1024 * 1024  # safe on v5e/v6e (128 MiB) and v7x (64 MiB)
_BLOCK_BUDGET_BYTES = 20 * 1024 * 1024  # budget for double-buffered x/out blocks


def _round_down(x, m):
    return max(m, (x // m) * m)


def _round_up(x, m):
    return ((x + m - 1) // m) * m


def _output_block_kernel(x_ref, w1_ref, b1_ref, w2_ref, b2_ref, o_ref):
    """One grid step: (Bblk, 128, T) channels-major pixels -> (Bblk, n_out, T)."""
    w1 = w1_ref[...]          # (128, 128)   bf16, VMEM-resident
    b1 = b1_ref[...]          # (128, 1)     f32
    w2 = w2_ref[...]          # (n_out, 128) bf16
    b2 = b2_ref[...]          # (n_out, 1)   f32
    for b in range(x_ref.shape[0]):             # static unroll over packed batch
        x = x_ref[b].astype(jnp.bfloat16)       # (128, T) bf16 MXU operand
        h = jnp.dot(w1, x, preferred_element_type=jnp.float32)
        h = jnp.maximum(h + b1, 0.0).astype(jnp.bfloat16)   # f32 bias+ReLU
        y = jnp.dot(w2, h, preferred_element_type=jnp.float32)
        o_ref[b] = (y + b2).astype(o_ref.dtype)


def _pick_tiling(B, HW, n_out, x_itemsize, out_itemsize):
    """Choose (batch_block, pixel_tile) from a VMEM budget + megacore rules."""
    out_sublanes = max(8, _round_up(n_out, 8))          # sublane-padded output
    # Bytes per pixel column per pipeline buffer (x block + out block).
    per_pixel = C_MID * x_itemsize + out_sublanes * out_itemsize
    max_pixels = _BLOCK_BUDGET_BYTES // (2 * per_pixel)  # double-buffered
    max_pixels = min(_MAX_TILE_PIXELS, _round_down(max_pixels, 128))

    if HW >= max_pixels:
        bblk, t = 1, max_pixels                          # lane-dense, %128 == 0
    else:
        # Small spatial extent: take the full pixel axis (exempt from the
        # 128-divisibility rule) and pack several images per grid step.
        bblk = min(B, _MAX_BATCH_PACK, max(1, max_pixels // HW))
        t = HW

    # Keep >= 2 total grid steps when possible so both v7x TensorCores work.
    if pl.cdiv(B, bblk) * pl.cdiv(HW, t) == 1:
        if bblk > 1:
            bblk = pl.cdiv(B, 2)
        elif HW > 128:
            t = _round_up(pl.cdiv(HW, 2), 128)
    return bblk, t


def _build_call(B, HW, n_out, bblk, t, x_dtype, out_dtype, single_buffer_weights):
    wmode = {}
    if single_buffer_weights:
        # Weights/biases are grid-invariant; one buffer is enough.
        wmode = dict(pipeline_mode=pl.Buffered(buffer_count=1))

    x_bytes = jnp.dtype(x_dtype).itemsize
    o_bytes = jnp.dtype(out_dtype).itemsize
    cost = pl.CostEstimate(
        flops=2 * B * HW * (C_MID * C_MID + n_out * C_MID),
        transcendentals=0,
        bytes_accessed=(B * HW * (C_MID * x_bytes + n_out * o_bytes)
                        + (C_MID + n_out) * C_MID * 2      # bf16 weights
                        + (C_MID + n_out) * 4),             # f32 biases
    )

    return pl.pallas_call(
        _output_block_kernel,
        out_shape=jax.ShapeDtypeStruct((B, n_out, HW), out_dtype),
        grid=(pl.cdiv(B, bblk), pl.cdiv(HW, t)),
        in_specs=[
            pl.BlockSpec((bblk, C_MID, t), lambda b, j: (b, 0, j)),   # x tile
            pl.BlockSpec((C_MID, C_MID), lambda b, j: (0, 0), **wmode),  # W1
            pl.BlockSpec((C_MID, 1), lambda b, j: (0, 0), **wmode),      # b1
            pl.BlockSpec((n_out, C_MID), lambda b, j: (0, 0), **wmode),  # W2
            pl.BlockSpec((n_out, 1), lambda b, j: (0, 0), **wmode),      # b2
        ],
        out_specs=pl.BlockSpec((bblk, n_out, t), lambda b, j: (b, 0, j)),
        compiler_params=pltpu.CompilerParams(
            dimension_semantics=("parallel", "parallel"),
            vmem_limit_bytes=_VMEM_LIMIT_BYTES),
        cost_estimate=cost,
    )


def output_block_forward(skip, w1, b1, w2, b2, *, out_dtype=None):
    """Pallas equivalent of _OutputBlock.forward.

    Args:
      skip: (B, 128, H, W) summed skip connections (NCHW); f32 or bf16.
      w1:   (128, 128) skip_conv1 weight (Conv2d (OC, IC, 1, 1) squeezed).
      b1:   (128,)     skip_conv1 bias.
      w2:   (n_channels, 128) skip_conv2 weight squeezed.
      b2:   (n_channels,)     skip_conv2 bias.
    Returns:
      (B, n_channels, H, W) in `out_dtype` (defaults to skip.dtype).
    """
    B, C, H, W = skip.shape
    assert C == C_MID, "module fixes the skip-connection width to 128"
    n_out = w2.shape[0]
    HW = H * W
    out_dtype = jnp.dtype(out_dtype) if out_dtype is not None else skip.dtype

    # Free reshape to channels-major pixels (no data movement, no transpose).
    x = skip.reshape(B, C, HW)

    # bf16 MXU operands; accumulation / bias / ReLU stay f32.
    w1b = jnp.asarray(w1).reshape(C_MID, C_MID).astype(jnp.bfloat16)
    w2b = jnp.asarray(w2).reshape(n_out, C_MID).astype(jnp.bfloat16)
    b1c = jnp.asarray(b1).reshape(C_MID, 1).astype(jnp.float32)
    b2c = jnp.asarray(b2).reshape(n_out, 1).astype(jnp.float32)

    bblk, t = _pick_tiling(B, HW, n_out,
                           jnp.dtype(skip.dtype).itemsize,
                           jnp.dtype(out_dtype).itemsize)

    try:
        call = _build_call(B, HW, n_out, bblk, t, skip.dtype, out_dtype, True)
        out_flat = call(x, w1b, b1c, w2b, b2c)
    except Exception:
        # pipeline_mode=pl.Buffered(1) unsupported on this jax/Mosaic build:
        # fall back to default double-buffered (still grid-invariant) weights.
        call = _build_call(B, HW, n_out, bblk, t, skip.dtype, out_dtype, False)
        out_flat = call(x, w1b, b1c, w2b, b2c)

    # Free reshape back to NCHW.
    return out_flat.reshape(B, n_out, H, W)


if __name__ == "__main__":
    key = jax.random.PRNGKey(0)
    k_x, k_w1, k_b1, k_w2, k_b2 = jax.random.split(key, 5)

    B, H, W = 2, 16, 16
    n_channels = 4

    skip = jax.random.normal(k_x, (B, C_MID, H, W), dtype=jnp.float32)

    # Conv2d default init: uniform(-1/sqrt(fan_in), 1/sqrt(fan_in)), fan_in=128.
    bound = 1.0 / (C_MID ** 0.5)
    w1 = jax.random.uniform(k_w1, (C_MID, C_MID), jnp.float32, -bound, bound)
    b1 = jax.random.uniform(k_b1, (C_MID,), jnp.float32, -bound, bound)
    w2 = jax.random.uniform(k_w2, (n_channels, C_MID), jnp.float32, -bound, bound)
    b2 = jax.random.uniform(k_b2, (n_channels,), jnp.float32, -bound, bound)

    out = output_block_forward(skip, w1, b1, w2, b2)
    out = jax.block_until_ready(out)

    # Plain-JAX reference (1x1 conv == channel matmul), high precision.
    hp = jax.lax.Precision.HIGHEST
    h = jnp.einsum("bchw,oc->bohw", skip, w1, precision=hp) + b1[None, :, None, None]
    h = jnp.maximum(h, 0.0)
    ref = jnp.einsum("bchw,oc->bohw", h, w2, precision=hp) + b2[None, :, None, None]

    assert out.shape == (B, n_channels, H, W)
    assert jnp.allclose(out, ref, atol=2e-2, rtol=2e-2)

    print("KERNEL_OK")
</pallas_src>

<mosaic_0001>
module attributes {stable_mosaic.version = 11 : i64} {
  func.func @_output_block_kernel(%arg0: i32, %arg1: i32, %arg2: memref<1x128x256xf32, #tpu.memory_space<vmem>>, %arg3: memref<128x128xbf16, #tpu.memory_space<vmem>>, %arg4: memref<128x1xf32, #tpu.memory_space<vmem>>, %arg5: memref<4x128xbf16, #tpu.memory_space<vmem>>, %arg6: memref<4x1xf32, #tpu.memory_space<vmem>>, %arg7: memref<1x4x256xf32, #tpu.memory_space<vmem>>) attributes {dimension_semantics = [#tpu.dimension_semantics<parallel>, #tpu.dimension_semantics<parallel>], iteration_bounds = array<i64: 2, 1>, scalar_prefetch = 0 : i64, scratch_operands = 0 : i64, tpu.core_type = #tpu.core_type<tc>, window_params = [{transform_indices = @transform_0, window_bounds = array<i64: 1, 128, 256>}, {pipeline_mode = #tpu.pipeline_mode<synchronous>, transform_indices = @transform_1, window_bounds = array<i64: 128, 128>}, {pipeline_mode = #tpu.pipeline_mode<synchronous>, transform_indices = @transform_2, window_bounds = array<i64: 128, 1>}, {pipeline_mode = #tpu.pipeline_mode<synchronous>, transform_indices = @transform_3, window_bounds = array<i64: 4, 128>}, {pipeline_mode = #tpu.pipeline_mode<synchronous>, transform_indices = @transform_4, window_bounds = array<i64: 4, 1>}, {transform_indices = @transform_5, window_bounds = array<i64: 1, 4, 256>}]} {
    %c0 = arith.constant 0 : index
    %c0_0 = arith.constant 0 : index
    %0 = vector.load %arg3[%c0, %c0_0] : memref<128x128xbf16, #tpu.memory_space<vmem>>, vector<128x128xbf16>
    %c0_1 = arith.constant 0 : index
    %c0_2 = arith.constant 0 : index
    %1 = vector.load %arg4[%c0_1, %c0_2] : memref<128x1xf32, #tpu.memory_space<vmem>>, vector<128x1xf32>
    %c0_3 = arith.constant 0 : index
    %c0_4 = arith.constant 0 : index
    %2 = vector.load %arg5[%c0_3, %c0_4] : memref<4x128xbf16, #tpu.memory_space<vmem>>, vector<4x128xbf16>
    %c0_5 = arith.constant 0 : index
    %c0_6 = arith.constant 0 : index
    %3 = vector.load %arg6[%c0_5, %c0_6] : memref<4x1xf32, #tpu.memory_space<vmem>>, vector<4x1xf32>
    %c0_7 = arith.constant 0 : index
    %c0_8 = arith.constant 0 : index
    %c0_9 = arith.constant 0 : index
    %4 = vector.load %arg2[%c0_7, %c0_8, %c0_9] : memref<1x128x256xf32, #tpu.memory_space<vmem>>, vector<1x128x256xf32>
    %5 = vector.shape_cast %4 : vector<1x128x256xf32> to vector<128x256xf32>
    %6 = arith.truncf %5 : vector<128x256xf32> to vector<128x256xbf16>
    %cst = arith.constant dense<0.000000e+00> : vector<128x256xf32>
    %7 = tpu.matmul %0, %6, %cst {dimension_numbers = #tpu.dot_dimension_numbers<[1], [0], [0], [1], [0, 0, 1, 1], [], []>} : vector<128x128xbf16>, vector<128x256xbf16>, vector<128x256xf32> -> vector<128x256xf32>
    %8 = vector.broadcast %1 : vector<128x1xf32> to vector<128x256xf32>
    %9 = arith.addf %7, %8 : vector<128x256xf32>
    %cst_10 = arith.constant 0.000000e+00 : f32
    %10 = vector.broadcast %cst_10 : f32 to vector<128x256xf32>
    %11 = arith.maximumf %9, %10 : vector<128x256xf32>
    %12 = arith.truncf %11 : vector<128x256xf32> to vector<128x256xbf16>
    %cst_11 = arith.constant dense<0.000000e+00> : vector<4x256xf32>
    %13 = tpu.matmul %2, %12, %cst_11 {dimension_numbers = #tpu.dot_dimension_numbers<[1], [0], [0], [1], [0, 0, 1, 1], [], []>} : vector<4x128xbf16>, vector<128x256xbf16>, vector<4x256xf32> -> vector<4x256xf32>
    %14 = vector.broadcast %3 : vector<4x1xf32> to vector<4x256xf32>
    %15 = arith.addf %13, %14 : vector<4x256xf32>
    %c0_12 = arith.constant 0 : index
    %c0_13 = arith.constant 0 : index
    %c0_14 = arith.constant 0 : index
    %16 = vector.load %arg7[%c0_12, %c0_13, %c0_14] : memref<1x4x256xf32, #tpu.memory_space<vmem>>, vector<1x4x256xf32>
    %17 = vector.shape_cast %16 : vector<1x4x256xf32> to vector<4x256xf32>
    %18 = vector.shape_cast %15 : vector<4x256xf32> to vector<1x4x256xf32>
    tpu.vector_store %arg7[%c0_12, %c0_13, %c0_14], %18 {strides = array<i32>} : memref<1x4x256xf32, #tpu.memory_space<vmem>>, vector<1x4x256xf32>,
    return
  }
  func.func @transform_0(%arg0: i32, %arg1: i32) -> (i32, i32, i32) {
    %c0_i32 = arith.constant 0 : i32
    %c0_i32_0 = arith.constant 0 : i32
    return %arg0, %c0_i32, %arg1 : i32, i32, i32
  }
  func.func @transform_1(%arg0: i32, %arg1: i32) -> (i32, i32) {
    %c0_i32 = arith.constant 0 : i32
    %c0_i32_0 = arith.constant 0 : i32
    %c0_i32_1 = arith.constant 0 : i32
    return %c0_i32, %c0_i32_0 : i32, i32
  }
  func.func @transform_2(%arg0: i32, %arg1: i32) -> (i32, i32) {
    %c0_i32 = arith.constant 0 : i32
    %c0_i32_0 = arith.constant 0 : i32
    %c0_i32_1 = arith.constant 0 : i32
    return %c0_i32, %c0_i32_0 : i32, i32
  }
  func.func @transform_3(%arg0: i32, %arg1: i32) -> (i32, i32) {
    %c0_i32 = arith.constant 0 : i32
    %c0_i32_0 = arith.constant 0 : i32
    %c0_i32_1 = arith.constant 0 : i32
    return %c0_i32, %c0_i32_0 : i32, i32
  }
  func.func @transform_4(%arg0: i32, %arg1: i32) -> (i32, i32) {
    %c0_i32 = arith.constant 0 : i32
    %c0_i32_0 = arith.constant 0 : i32
    %c0_i32_1 = arith.constant 0 : i32
    return %c0_i32, %c0_i32_0 : i32, i32
  }
  func.func @transform_5(%arg0: i32, %arg1: i32) -> (i32, i32, i32) {
    %c0_i32 = arith.constant 0 : i32
    %c0_i32_0 = arith.constant 0 : i32
    return %arg0, %c0_i32, %arg1 : i32, i32, i32
  }
}

module attributes {stable_mosaic.version = 11 : i64} {
  func.func @_output_block_kernel(%arg0: i32, %arg1: i32, %arg2: memref<1x128x256xf32, #tpu.memory_space<vmem>>, %arg3: memref<128x128xbf16, #tpu.memory_space<vmem>>, %arg4: memref<128x1xf32, #tpu.memory_space<vmem>>, %arg5: memref<4x128xbf16, #tpu.memory_space<vmem>>, %arg6: memref<4x1xf32, #tpu.memory_space<vmem>>, %arg7: memref<1x4x256xf32, #tpu.memory_space<vmem>>) attributes {dimension_semantics = [#tpu.dimension_semantics<parallel>, #tpu.dimension_semantics<parallel>], iteration_bounds = array<i64: 2, 1>, scalar_prefetch = 0 : i64, scratch_operands = 0 : i64, tpu.core_type = #tpu.core_type<tc>, window_params = [{transform_indices = @transform_0, window_bounds = array<i64: 1, 128, 256>}, {pipeline_mode = #tpu.pipeline_mode<synchronous>, transform_indices = @transform_1, window_bounds = array<i64: 128, 128>}, {pipeline_mode = #tpu.pipeline_mode<synchronous>, transform_indices = @transform_2, window_bounds = array<i64: 128, 1>}, {pipeline_mode = #tpu.pipeline_mode<synchronous>, transform_indices = @transform_3, window_bounds = array<i64: 4, 128>}, {pipeline_mode = #tpu.pipeline_mode<synchronous>, transform_indices = @transform_4, window_bounds = array<i64: 4, 1>}, {transform_indices = @transform_5, window_bounds = array<i64: 1, 4, 256>}]} {
    %c0 = arith.constant 0 : index
    %c0_0 = arith.constant 0 : index
    %0 = vector.load %arg3[%c0, %c0_0] : memref<128x128xbf16, #tpu.memory_space<vmem>>, vector<128x128xbf16>
    %c0_1 = arith.constant 0 : index
    %c0_2 = arith.constant 0 : index
    %1 = vector.load %arg4[%c0_1, %c0_2] : memref<128x1xf32, #tpu.memory_space<vmem>>, vector<128x1xf32>
    %c0_3 = arith.constant 0 : index
    %c0_4 = arith.constant 0 : index
    %2 = vector.load %arg5[%c0_3, %c0_4] : memref<4x128xbf16, #tpu.memory_space<vmem>>, vector<4x128xbf16>
    %c0_5 = arith.constant 0 : index
    %c0_6 = arith.constant 0 : index
    %3 = vector.load %arg6[%c0_5, %c0_6] : memref<4x1xf32, #tpu.memory_space<vmem>>, vector<4x1xf32>
    %c0_7 = arith.constant 0 : index
    %c0_8 = arith.constant 0 : index
    %c0_9 = arith.constant 0 : index
    %4 = vector.load %arg2[%c0_7, %c0_8, %c0_9] : memref<1x128x256xf32, #tpu.memory_space<vmem>>, vector<1x128x256xf32>
    %5 = vector.shape_cast %4 : vector<1x128x256xf32> to vector<128x256xf32>
    %6 = arith.truncf %5 : vector<128x256xf32> to vector<128x256xbf16>
    %cst = arith.constant dense<0.000000e+00> : vector<128x256xf32>
    %7 = tpu.matmul %0, %6, %cst {dimension_numbers = #tpu.dot_dimension_numbers<[1], [0], [0], [1], [0, 0, 1, 1], [], []>} : vector<128x128xbf16>, vector<128x256xbf16>, vector<128x256xf32> -> vector<128x256xf32>
    %8 = vector.broadcast %1 : vector<128x1xf32> to vector<128x256xf32>
    %9 = arith.addf %7, %8 : vector<128x256xf32>
    %cst_10 = arith.constant 0.000000e+00 : f32
    %10 = vector.broadcast %cst_10 : f32 to vector<128x256xf32>
    %11 = arith.maximumf %9, %10 : vector<128x256xf32>
    %12 = arith.truncf %11 : vector<128x256xf32> to vector<128x256xbf16>
    %cst_11 = arith.constant dense<0.000000e+00> : vector<4x256xf32>
    %13 = tpu.matmul %2, %12, %cst_11 {dimension_numbers = #tpu.dot_dimension_numbers<[1], [0], [0], [1], [0, 0, 1, 1], [], []>} : vector<4x128xbf16>, vector<128x256xbf16>, vector<4x256xf32> -> vector<4x256xf32>
    %14 = vector.broadcast %3 : vector<4x1xf32> to vector<4x256xf32>
    %15 = arith.addf %13, %14 : vector<4x256xf32>
    %c0_12 = arith.constant 0 : index
    %c0_13 = arith.constant 0 : index
    %c0_14 = arith.constant 0 : index
    %16 = vector.load %arg7[%c0_12, %c0_13, %c0_14] : memref<1x4x256xf32, #tpu.memory_space<vmem>>, vector<1x4x256xf32>
    %17 = vector.shape_cast %16 : vector<1x4x256xf32> to vector<4x256xf32>
    %18 = vector.shape_cast %15 : vector<4x256xf32> to vector<1x4x256xf32>
    tpu.vector_store %arg7[%c0_12, %c0_13, %c0_14], %18 {strides = array<i32>} : memref<1x4x256xf32, #tpu.memory_space<vmem>>, vector<1x4x256xf32>,
    return
  }
  func.func @transform_0(%arg0: i32, %arg1: i32) -> (i32, i32, i32) {
    %c0_i32 = arith.constant 0 : i32
    %c0_i32_0 = arith.constant 0 : i32
    return %arg0, %c0_i32, %arg1 : i32, i32, i32
  }
  func.func @transform_1(%arg0: i32, %arg1: i32) -> (i32, i32) {
    %c0_i32 = arith.constant 0 : i32
    %c0_i32_0 = arith.constant 0 : i32
    %c0_i32_1 = arith.constant 0 : i32
    return %c0_i32, %c0_i32_0 : i32, i32
  }
  func.func @transform_2(%arg0: i32, %arg1: i32) -> (i32, i32) {
    %c0_i32 = arith.constant 0 : i32
    %c0_i32_0 = arith.constant 0 : i32
    %c0_i32_1 = arith.constant 0 : i32
    return %c0_i32, %c0_i32_0 : i32, i32
  }
  func.func @transform_3(%arg0: i32, %arg1: i32) -> (i32, i32) {
    %c0_i32 = arith.constant 0 : i32
    %c0_i32_0 = arith.constant 0 : i32
    %c0_i32_1 = arith.constant 0 : i32
    return %c0_i32, %c0_i32_0 : i32, i32
  }
  func.func @transform_4(%arg0: i32, %arg1: i32) -> (i32, i32) {
    %c0_i32 = arith.constant 0 : i32
    %c0_i32_0 = arith.constant 0 : i32
    %c0_i32_1 = arith.constant 0 : i32
    return %c0_i32, %c0_i32_0 : i32, i32
  }
  func.func @transform_5(%arg0: i32, %arg1: i32) -> (i32, i32, i32) {
    %c0_i32 = arith.constant 0 : i32
    %c0_i32_0 = arith.constant 0 : i32
    return %arg0, %c0_i32, %arg1 : i32, i32, i32
  }
}

</mosaic_0001>

<bundles_post_ra>
// kernel: tpu_custom_call.1
= control target key start
LH: loop header
LB: loop body
LE: loop exit
PB: predicated region body
PF: predicated region fallthrough
CT: control target
= control target key end

     0   :  { %10 = vsyncpa [#allocation3], 0  ;;  %s1369_s0 = inlined_call_operand.hbm [shape: f32[2,128,256], index: 0, kind: input, shape index: {}]   ;;  %s1370_s1 = inlined_call_operand.vmem [shape: bf16[128,128], index: 1, kind: input, shape index: {}]   ;;  %s1371_s2 = inlined_call_operand.vmem [shape: f32[128,1], index: 2, kind: input, shape index: {}]   ;;  %s1372_s3 = inlined_call_operand.vmem [shape: bf16[4,128], index: 3, kind: input, shape index: {}]   ;;  %s1373_s4 = inlined_call_operand.vmem [shape: f32[4,1], index: 4, kind: input, shape index: {}]   ;;  %s1374_s5 = inlined_call_operand.hbm [shape: f32[2,4,256], index: 5, kind: output, shape index: {}]  }
   0x1   :  { %12 = vsyncpa [#allocation3 + $0x1], 0 }
   0x2   :  { %13 = vsyncpa [#allocation4], 0 }
   0x3   :  { %15 = vsyncpa [#allocation4 + $0x1], 0  ;;  %s1032_s18 = smov 0   ;;  %s1034_s19 = smov 0  }
   0x4   :  { %s1036_s20 = smov 0   ;;  %s1038_s21 = smov 0  }
   0x5   :  { %s1040_s22 = smov 0   ;;  %s1042_s23 = smov 0  }
   0x6 LB: > { %s787_s24 = sadd.s32 4294967295, %s995_s23   ;;  %s788_s25 = sadd.s32 4294967294, %s995_s23   ;;  %s995_s23 = sphi %s1042_s23, %s21_s23   ;;  %s991_s22 = sphi %s1040_s22, %s1385_s22   ;;  %s987_s21 = sphi %s1038_s21, %s1384_s21   ;;  %s983_s20 = sphi %s1036_s20, %s1383_s20   ;;  %s979_s19 = sphi %s1034_s19, %s1382_s19   ;;  %s975_s18 = sphi %s1032_s18, %s1381_s18  }
   0x7   : > { %s33_s26 = sadd.s32 1, %s991_s22  ;;  %s42_s27 = sadd.s32 1, %s983_s20 }
   0x8   : > { %p35_p0 = scmp.ge.s32.totalorder %s33_s26, 2  ;;  %p49_p1 = scmp.ne.s32.totalorder %s983_s20, %s979_s19 }
   0x9   : > { %p50_p2 = scmp.eq.s32.totalorder %s995_s23, 0  ;;  %p55_p3 = scmp.ne.s32.totalorder %s979_s19, %s975_s18 }
   0xa   : > { %s1387_s26 = smov (%p35_p0, %s33_s26), 0  ;;  %p56_p5 = scmp.eq.s32.totalorder %s787_s24, 0 }
   0xb   : > { %p1073_p4 = por %p50_p2, %p49_p1  ;;  %s37_s29 = ssub.s32 %s991_s22, %s1387_s26 }
   0xc   : > { %p165_p6 = scmp.eq.s32.totalorder %s787_s24, 1  ;;  %p40_p7 = scmp.eq.s32.totalorder %s37_s29, 0 }
   0xd   : > { %p1079_p8 = por %p56_p5, %p55_p3  ;;  %p171_p10 = scmp.eq.s32.totalorder %s788_s25, 1 }
   0xe   : > { %p1083_p9 = por %p165_p6, %p49_p1  ;;  %p824_p13 = scmp.lt.s32.totalorder %s995_s23, 2 }
   0xf   : > { %s1088_s7 = scalar_select %p40_p7, %s983_s20, %s42_s27  }
  0x10   : > { %p1090_p11 = por %p171_p10, %p55_p3  ;;  %s203_s9 = sand.u32 1, %s983_s20  }
  0x11   : > { %s791_s10 = sshll.u32 %s203_s9, 8  ;;  %s810_s11 = sshll.u32 %s991_s22, 12 }
  0x12   : > { %s215_s14 = scalar_lea.hbm %s1369_s0, %s810_s11  ;;  %s207_s15 = scalar_lea.vmem [#allocation2], %s791_s10 }
  0x13   : > { %s216_s16 = sshll.u32 %s207_s15, 4  ;;  %p1103_p0 = pnand %p824_p13, %p1073_p4  ;;  %s217_s16 = int_to_ptr.vmem [resolvable:$true] %s216_s16 }
  0x14   : > { %p794_p1 = scmp.ge.s32.totalorder %s995_s23, 1  ;;  %s204_s24 = scalar_lea.sflag [#allocation3], %s203_s9 }
  0x15   : > { %p889_p2 = pneg %p1103_p0  ;;  %s900_s25 = scalar_lea.vmem %s217_s16, 4096 }
  0x16   : > { %p901_p3 = scmp.ne.s32.totalorder %s217_s16, %s900_s25  ;;  %s997_s27 = smov [#allocation2]  }
  0x17   : > { %s905_s29 = sshll.u32 %s997_s27, 4  ;;  %s906_s29 = int_to_ptr.vmem [resolvable:$false] %s905_s29 }
  0x18   : > { %p903_p5 = pnand %p901_p3, %p889_p2  ;;  %s907_s10 = scalar_lea.vmem %s906_s29, 8192 }
  0x19   : > { %p908_p7 = scmp.lt.s32.totalorder %s217_s16, %s906_s29  ;;  %p909_p10 = scmp.lt.s32.totalorder %s907_s10, %s900_s25 }
  0x1a   : > { %p904_p6 = pneg %p903_p5 }
  0x1b   : > { %p910_p12 = por %p909_p10, %p908_p7 }
  0x1d   : > { %p911_p4 = pnand %p910_p12, %p904_p6 }
  0x1f   : > { %914 = shalt.err (!%p911_p4)
}
  0x20   : > { %s998_s28 = smov 256   ;;  %s999_s9 = smov 16  }
  0x21   : > { %819 = dma.hbm_to_vmem [thread:$0]  (!%p1103_p0), %s215_s14, 4096, %s217_s16, %s204_s24, %s998_s28, %s998_s28, %s999_s9  }
  0x22   : > { %p224_p13 = scmp.lt.s32.totalorder %s995_s23, 3 }
  0x24   : > { %p225_p2 = pnand %p794_p1, %p224_p13 }
  0x25   : > { %s1116_s11 = sand.u32 (!%p225_p2), 1, %s979_s19  }
  0x26   : > { %228 = sbr.rel (%p225_p2) target bundleno = 584 (0x248), region = 40  ;;  %s795_s12 = sshll.u32 (!%p225_p2), %s1116_s11, 8 }
  0x27   : > { %s231_s13 = scalar_lea.sflag (!%p225_p2), [#allocation3], %s1116_s11  ;;  %s1120_s15 = scalar_lea.vmem (!%p225_p2), [#allocation2], %s795_s12 }
  0x2b   : > { %966 = dma.done.wait (%p1079_p8), %s231_s13, 4096  }
  0x2c   : > { %968 = vsyncadd (%p1079_p8), %s231_s13, 4294963200  ;;  %v1000_v0 = vmov 0   ;;  %v327_v1 = vld [vmem:[%s1120_s15 + $0xe8] sm:$0xff]  ;;  %v329_v2 = vld [vmem:[%s1120_s15 + $0xf8] sm:$0xff]  ;;  %s796_s9 = sshll.u32 %s1116_s11, 3  ;;  %s811_s12 = sshll.u32 %s987_s21, 7 }
  0x2d   : > { %506 = vmatprep.mubr.bf16.mxu0 %v1000_v0  ;;  %877 = vset.pattern.permute.xlu0 %v1000_v0  ;;  %v326_v3 = vld [vmem:[%s1120_s15 + $0xe0] sm:$0xff]  ;;  %v345_v4 = vpack.c.bf16 %v329_v2, %v327_v1  ;;  %v328_v5 = vld [vmem:[%s1120_s15 + $0xf0] sm:$0xff]  ;;  %v323_v6 = vld [vmem:[%s1120_s15 + $0xc8] sm:$0xff]  ;;  %s260_s13 = scalar_lea.vmem [#allocation5], %s796_s9  ;;  %s1327_s17 = scalar_lea.hbm %s1374_s5, %s811_s12 }
  0x2e   : > { %878 = vset.pattern.permute.xlu1 %v1000_v0  ;;  %672 = vmatprep.mubr.bf16.mxu1 %v1000_v0  ;;  %v325_v7 = vld [vmem:[%s1120_s15 + $0xd8] sm:$0xff]  ;;  %v344_v8 = vpack.c.bf16 %v328_v5, %v326_v3  ;;  %v322_v10 = vld [vmem:[%s1120_s15 + $0xc0] sm:$0xff]  ;;  %v324_v11 = vld [vmem:[%s1120_s15 + $0xd0] sm:$0xff]  ;;  %s703_s30 = sshll.u32 %s260_s13, 4  ;;  %s687_s24 = scalar_lea.sflag [#allocation4], %s1116_s11  ;;  %s704_s30 = int_to_ptr.vmem [resolvable:$true] %s703_s30 }
  0x2f   : > { %v343_v9 = vpack.c.bf16 %v325_v7, %v323_v6  ;;  %v319_v12 = vld [vmem:[%s1120_s15 + $0xa8] sm:$0xff]  ;;  %474 = vmatprep.subr.bf16.mxu0 %v345_v4  ;;  %v321_v13 = vld [vmem:[%s1120_s15 + $0xb8] sm:$0xff]  ;;  %v342_v14 = vpack.c.bf16 %v324_v11, %v322_v10  ;;  %v318_v16 = vld [vmem:[%s1120_s15 + $0xa0] sm:$0xff]  ;;  %s1001_s21 = smov [#allocation5]  }
  0x30   : > { %475 = vmatpush1.bf16.msra.mxu0 %v344_v8  ;;  %v341_v15 = vpack.c.bf16 %v321_v13, %v319_v12  ;;  %v320_v17 = vld [vmem:[%s1120_s15 + $0xb0] sm:$0xff]  ;;  %v315_v18 = vld [vmem:[%s1120_s15 + $0x88] sm:$0xff]  ;;  %v317_v19 = vld [vmem:[%s1120_s15 + $0x98] sm:$0xff]  ;;  %s919_s25 = sshll.u32 %s1001_s21, 4  ;;  %s920_s25 = int_to_ptr.vmem [resolvable:$false] %s919_s25 }
  0x31   : > { %476 = vmatprep.subr.bf16.mxu0 %v343_v9  ;;  %v340_v20 = vpack.c.bf16 %v320_v17, %v318_v16  ;;  %v339_v21 = vpack.c.bf16 %v317_v19, %v315_v18  ;;  %v314_v22 = vld [vmem:[%s1120_s15 + $0x80] sm:$0xff]  ;;  %v316_v23 = vld [vmem:[%s1120_s15 + $0x90] sm:$0xff]  ;;  %v311_v24 = vld [vmem:[%s1120_s15 + $0x68] sm:$0xff]  ;;  %s921_s27 = scalar_lea.vmem %s920_s25, 256  ;;  %p922_p1 = scmp.lt.s32.totalorder %s704_s30, %s920_s25 }
  0x32   : > { %v313_v25 = vld [vmem:[%s1120_s15 + $0x78] sm:$0xff]  ;;  %v310_v26 = vld [vmem:[%s1120_s15 + $0x60] sm:$0xff]  ;;  %v338_v27 = vpack.c.bf16 %v316_v23, %v314_v22  ;;  %v312_v28 = vld [vmem:[%s1120_s15 + $0x70] sm:$0xff] }
  0x33   : > { %v337_v29 = vpack.c.bf16 %v313_v25, %v311_v24  ;;  %v307_v30 = vld [vmem:[%s1120_s15 + $0x48] sm:$0xff]  ;;  %v309_v31 = vld [vmem:[%s1120_s15 + $0x58] sm:$0xff]  ;;  %v306_v32 = vld [vmem:[%s1120_s15 + $0x40] sm:$0xff]  ;;  %v336_v33 = vpack.c.bf16 %v312_v28, %v310_v26 }
  0x34   : > { %477 = vmatpush1.bf16.msra.mxu0 %v342_v14  ;;  %v308_v34 = vld [vmem:[%s1120_s15 + $0x50] sm:$0xff]  ;;  %v335_v36 = vpack.c.bf16 %v309_v31, %v307_v30  ;;  %v303_v37 = vld [vmem:[%s1120_s15 + $0x28] sm:$0xff]  ;;  %v292_v38 = vld [vmem:[%s1371_s2 + $0x60] sm:$0xff] }
  0x35   : > { %478 = vmatprep.subr.bf16.mxu0 %v341_v15  ;;  %v294_v35 = vld [vmem:[%s1371_s2 + $0x70] sm:$0xff]  ;;  %v305_v39 = vld [vmem:[%s1120_s15 + $0x38] sm:$0xff]  ;;  %408 = vperm.xlu1 %878, %v292_v38   ;;  %v293_v41 = vld [vmem:[%s1371_s2 + $0x68] sm:$0xff]  ;;  %v334_v42 = vpack.c.bf16 %v308_v34, %v306_v32 }
  0x36   : > { %418 = vperm.xlu0 %877, %v294_v35   ;;  %v295_v40 = vld [vmem:[%s1371_s2 + $0x78] sm:$0xff]  ;;  %v333_v43 = vpack.c.bf16 %v305_v39, %v303_v37  ;;  %v302_v44 = vld [vmem:[%s1120_s15 + $0x20] sm:$0xff]  ;;  %v304_v45 = vld [vmem:[%s1120_s15 + $0x30] sm:$0xff] }
  0x37   : > { %v299_v46 = vld [vmem:[%s1120_s15 + $0x8] sm:$0xff]  ;;  %v301_v47 = vld [vmem:[%s1120_s15 + $0x18] sm:$0xff]  ;;  %v290_v48 = vld [vmem:[%s1371_s2 + $0x50] sm:$0xff]  ;;  %v332_v50 = vpack.c.bf16 %v304_v45, %v302_v44 }
  0x38   : > { %479 = vmatpush1.bf16.msra.mxu0 %v340_v20  ;;  %v291_v49 = vld [vmem:[%s1371_s2 + $0x58] sm:$0xff]  ;;  %v331_v51 = vpack.c.bf16 %v301_v47, %v299_v46  ;;  %v298_v52 = vld [vmem:[%s1120_s15] sm:$0xff]  ;;  %v300_v53 = vld [vmem:[%s1120_s15 + $0x10] sm:$0xff]  ;;  %s915_s15 = scalar_lea.vmem %s704_s30, 128 }
  0x39   : > { %480 = vmatprep.subr.bf16.mxu0 %v339_v21  ;;  %413 = vperm.xlu1 %878, %v293_v41   ;;  %v288_v54 = vld [vmem:[%s1371_s2 + $0x40] sm:$0xff]  ;;  %v289_v55 = vld [vmem:[%s1371_s2 + $0x48] sm:$0xff]  ;;  %v330_v56 = vpack.c.bf16 %v300_v53, %v298_v52  ;;  %v286_v57 = vld [vmem:[%s1371_s2 + $0x30] sm:$0xff]  ;;  %p916_p8 = scmp.ne.s32.totalorder %s704_s30, %s915_s15  ;;  %p923_p3 = scmp.lt.s32.totalorder %s921_s27, %s915_s15 }
  0x3a   : > { %423 = vperm.xlu0 %877, %v295_v40   ;;  %v879_v58 = vld [vmem:[%s1370_s1] sm:$0xff]   ;;  %v287_v59 = vld [vmem:[%s1371_s2 + $0x38] sm:$0xff]  ;;  %v285_v61 = vld [vmem:[%s1371_s2 + $0x28] sm:$0xff] }
  0x3b   : > { %v284_v60 = vld [vmem:[%s1371_s2 + $0x20] sm:$0xff]  ;;  %v282_v62 = vld [vmem:[%s1371_s2 + $0x10] sm:$0xff]  ;;  %v880_v63 = vld [vmem:[%s1370_s1 + $0x8] sm:$0xff]   ;;  %p917_p12 = pnand %p916_p8, %p1083_p9  ;;  %p924_p5 = por %p923_p3, %p922_p1 }
  0x3c   : > { %481 = vmatpush1.bf16.msra.mxu0 %v338_v27  ;;  %v283_v1 = vld [vmem:[%s1371_s2 + $0x18] sm:$0xff]  ;;  %v280_v2 = vld [vmem:[%s1371_s2] sm:$0xff]  ;;  %v281_v3 = vld [vmem:[%s1371_s2 + $0x8] sm:$0xff] }
  0x3d   : > { %482 = vmatprep.subr.bf16.mxu0 %v337_v29  ;;  %403 = vperm.xlu1 %878, %v291_v49   ;;  %v297_v4 = vld [vmem:[%s1373_s4] sm:$0xf]  ;;  %v881_v5 = vld [vmem:[%s1370_s1 + $0x10] sm:$0xff]   ;;  %v882_v6 = vld [vmem:[%s1370_s1 + $0x18] sm:$0xff]   ;;  %p918_p0 = pneg %p917_p12 }
  0x3e   : > { %398 = vperm.xlu0 %877, %v290_v48   ;;  %v883_v7 = vld [vmem:[%s1370_s1 + $0x20] sm:$0xff]   ;;  %v884_v8 = vld [vmem:[%s1370_s1 + $0x28] sm:$0xff]   ;;  %v885_v9 = vld [vmem:[%s1370_s1 + $0x30] sm:$0xff]  }
  0x3f   : > { %v886_v10 = vld [vmem:[%s1370_s1 + $0x38] sm:$0xff]   ;;  %p925_p6 = pnand %p924_p5, %p918_p0 }
  0x40   : > { %483 = vmatpush1.bf16.msra.mxu0 %v336_v33 }
  0x41   : > { %484 = vmatprep.subr.bf16.mxu0 %v335_v36  ;;  %393 = vperm.xlu1 %878, %v289_v55  }
  0x42   : > { %388 = vperm.xlu0 %877, %v288_v54  }
  0x44   : > { %485 = vmatpush1.bf16.msra.mxu0 %v334_v42 }
  0x45   : > { %486 = vmatprep.subr.bf16.mxu0 %v333_v43  ;;  %383 = vperm.xlu1 %878, %v287_v59  }
  0x46   : > { %378 = vperm.xlu0 %877, %v286_v57  }
  0x48   : > { %487 = vmatpush1.bf16.msra.mxu0 %v332_v50 }
  0x49   : > { %488 = vmatprep.subr.bf16.mxu0 %v331_v51  ;;  %373 = vperm.xlu1 %878, %v285_v61  }
  0x4a   : > { %368 = vperm.xlu0 %877, %v284_v60  }
  0x4c   : > { %489 = vmatpush1.bf16.msra.mxu0 %v330_v56 }
  0x4d   : > { %363 = vperm.xlu1 %878, %v283_v1  }
  0x4e   : > { %358 = vperm.xlu0 %877, %v282_v62  }
  0x4f   : > { %507 = vmatmul.mubr.bf16.vlgmr.msra.gmra.mxu0 %v879_v58 }
  0x50   : > { %516 = vmatprep.mubr.bf16.mxu0 %v1000_v0 }
  0x51   : > { %353 = vperm.xlu1 %878, %v281_v3  }
  0x52   : > { %348 = vperm.xlu0 %877, %v280_v2  }
  0x56   : > { %637 = vperm.xlu0 %877, %v297_v4  }
  0x57   : > { %517 = vmatmul.mubr.bf16.gmra.mxu0 %v880_v63 }
  0x58   : > { %526 = vmatprep.mubr.bf16.mxu0 %v1000_v0 }
  0x5f   : > { %527 = vmatmul.mubr.bf16.gmra.mxu0 %v881_v5 }
  0x60   : > { %536 = vmatprep.mubr.bf16.mxu0 %v1000_v0 }
  0x67   : > { %537 = vmatmul.mubr.bf16.gmra.mxu0 %v882_v6 }
  0x68   : > { %546 = vmatprep.mubr.bf16.mxu0 %v1000_v0 }
  0x6f   : > { %547 = vmatmul.mubr.bf16.gmra.mxu0 %v883_v7 }
  0x70   : > { %556 = vmatprep.mubr.bf16.mxu0 %v1000_v0 }
  0x77   : > { %557 = vmatmul.mubr.bf16.gmra.mxu0 %v884_v8 }
  0x78   : > { %566 = vmatprep.mubr.bf16.mxu0 %v1000_v0 }
  0x7f   : > { %567 = vmatmul.mubr.bf16.gmra.mxu0 %v885_v9 }
  0x80   : > { %576 = vmatprep.mubr.bf16.mxu0 %v1000_v0 }
  0x87   : > { %577 = vmatmul.mubr.bf16.gmra.mxu0 %v886_v10 }
  0xb0   : > { %v1246_v12 = vpop.permute.xlu1 %408 }
  0xb1   : > { %v1244_v11 = vpop.permute.xlu0 %418 }
  0xb4   : > { %v1250_v14 = vpop.permute.xlu1 %413 }
  0xb5   : > { %v1248_v13 = vpop.permute.xlu0 %423 }
  0xb8   : > { %v1254_v16 = vpop.permute.xlu1 %403 }
  0xb9   : > { %v1252_v15 = vpop.permute.xlu0 %398 }
  0xbc   : > { %v1258_v0 = vpop.permute.xlu1 %393 }
  0xbd   : > { %v1256_v17 = vpop.permute.xlu0 %388 }
  0xc0   : > { %v1262_v19 = vpop.permute.xlu1 %383 }
  0xc1   : > { %v1260_v18 = vpop.permute.xlu0 %378 }
  0xc4   : > { %v1266_v21 = vpop.permute.xlu1 %373 }
  0xc5   : > { %v1264_v20 = vpop.permute.xlu0 %368 }
  0xc8   : > { %v364_v23 = vpop.permute.xlu1 %363 }
  0xc9   : > { %v359_v22 = vpop.permute.xlu0 %358 }
  0xcc   : > { %v354_v27 = vpop.permute.xlu1 %353 }
  0xcd   : > { %v349_v24 = vpop.permute.xlu0 %348 }
 0x10f   : > { %v508_v25 = vpop.f32.mrf.mxu0 }
 0x110   : > { %v509_v28 = vadd.f32 %v508_v25, %v349_v24 }
 0x111   : > { %v510_v26 = vpop.f32.mrf.mxu0 }
 0x112   : > { %v511_v30 = vadd.f32 %v510_v26, %v349_v24  ;;  %v587_v33 = vmax.f32 %v509_v28, 0.0 }
 0x113   : > { %v512_v29 = vpop.f32.mrf.mxu0 }
 0x114   : > { %v513_v31 = vadd.f32 %v512_v29, %v354_v27  ;;  %v588_v37 = vmax.f32 %v511_v30, 0.0 }
 0x115   : > { %v514_v32 = vpop.f32.mrf.mxu0 }
 0x116   : > { %v589_v34 = vmax.f32 %v513_v31, 0.0  ;;  %v515_v35 = vadd.f32 %v514_v32, %v354_v27 }
 0x117   : > { %v518_v36 = vpop.f32.mrf.mxu0 }
 0x118   : > { %v1268_v38 = vpack.c.bf16 %v589_v34, %v587_v33  ;;  %v590_v39 = vmax.f32 %v515_v35, 0.0  ;;  %v519_v42 = vadd.f32 %v518_v36, %v359_v22 }
 0x119   : > { %v520_v40 = vpop.f32.mrf.mxu0 }
 0x11a   : > { %v1270_v41 = vpack.c.bf16 %v590_v39, %v588_v37  ;;  %v521_v44 = vadd.f32 %v520_v40, %v359_v22  ;;  %v591_v47 = vmax.f32 %v519_v42, 0.0 }
 0x11b   : > { %v522_v43 = vpop.f32.mrf.mxu0 }
 0x11c   : > { %v523_v45 = vadd.f32 %v522_v43, %v364_v23  ;;  %v592_v51 = vmax.f32 %v521_v44, 0.0 }
 0x11d   : > { %v524_v46 = vpop.f32.mrf.mxu0 }
 0x11e   : > { %v593_v48 = vmax.f32 %v523_v45, 0.0  ;;  %v525_v49 = vadd.f32 %v524_v46, %v364_v23 }
 0x11f   : > { %v1272_v50 = vpop.f32.mrf.mxu0 }
 0x120   : > { %v1274_v52 = vpack.c.bf16 %v593_v48, %v591_v47  ;;  %v594_v53 = vmax.f32 %v525_v49, 0.0 }
 0x121   : > { %v1276_v54 = vpop.f32.mrf.mxu0 }
 0x122   : > { %v1278_v55 = vpack.c.bf16 %v594_v53, %v592_v51 }
 0x123   : > { %v1280_v56 = vpop.f32.mrf.mxu0 }
 0x125   : > { %v1282_v57 = vpop.f32.mrf.mxu0 }
 0x127   : > { %v1284_v58 = vpop.f32.mrf.mxu0 }
 0x129   : > { %v540_v59 = vpop.f32.mrf.mxu0 }
 0x12b   : > { %v542_v60 = vpop.f32.mrf.mxu0 }
 0x12d   : > { %v544_v61 = vpop.f32.mrf.mxu0 }
 0x12f   : > { %v548_v62 = vpop.f32.mrf.mxu0 }
 0x131   : > { %v550_v63 = vpop.f32.mrf.mxu0 }
 0x133   : > { %v552_v1 = vpop.f32.mrf.mxu0 }
 0x134   : > { %v553_v53 = vadd.f32 %v552_v1, %v1258_v0 }
 0x135   : > { %v554_v2 = vpop.f32.mrf.mxu0 }
 0x137   : > { %v558_v3 = vpop.f32.mrf.mxu0 }
 0x138   : > { %v559_v48 = vadd.f32 %v558_v3, %v1252_v15 }
 0x139   : > { %v560_v4 = vpop.f32.mrf.mxu0 }
 0x13a   : > { %v561_v42 = vadd.f32 %v560_v4, %v1252_v15  ;;  %v541_v15 = vadd.f32 %v540_v59, %v1260_v18 }
 0x13b   : > { %v562_v5 = vpop.f32.mrf.mxu0 }
 0x13c   : > { %v563_v44 = vadd.f32 %v562_v5, %v1254_v16  ;;  %v608_v51 = vmax.f32 %v561_v42, 0.0  ;;  %v600_v59 = vmax.f32 %v541_v15, 0.0 }
 0x13d   : > { %v564_v6 = vpop.f32.mrf.mxu0 }
 0x13e   : > { %v565_v34 = vadd.f32 %v564_v6, %v1254_v16  ;;  %v609_v4 = vmax.f32 %v563_v44, 0.0  ;;  %v545_v16 = vadd.f32 %v544_v61, %v1262_v19  ;;  %v539_v61 = vadd.f32 %v1284_v58, %v1260_v18 }
 0x13f   : > { %v568_v7 = vpop.f32.mrf.mxu0 }
 0x140   : > { %v569_v39 = vadd.f32 %v568_v7, %v1246_v12  ;;  %v602_v1 = vmax.f32 %v545_v16, 0.0 }
 0x141   : > { %v570_v8 = vpop.f32.mrf.mxu0 }
 0x142   : > { %v571_v30 = vadd.f32 %v570_v8, %v1246_v12  ;;  %v611_v49 = vmax.f32 %v569_v39, 0.0  ;;  %v551_v12 = vadd.f32 %v550_v63, %v1256_v17  ;;  %v607_v8 = vmax.f32 %v559_v48, 0.0 }
 0x143   : > { %v572_v9 = vpop.f32.mrf.mxu0  ;;  %v543_v63 = vadd.f32 %v542_v60, %v1262_v19  ;;  %v533_v19 = vadd.f32 %v1280_v56, %v1266_v21  ;;  %v638_v56 = vpop.permute.xlu0 %637 }
 0x144   : > { %v573_v32 = vadd.f32 %v572_v9, %v1250_v14  ;;  %v612_v43 = vmax.f32 %v571_v30, 0.0  ;;  %v604_v3 = vmax.f32 %v551_v12, 0.0  ;;  %v605_v9 = vmax.f32 %v553_v53, 0.0 }
 0x145   : > { %v574_v10 = vpop.f32.mrf.mxu0  ;;  %v601_v60 = vmax.f32 %v543_v63, 0.0  ;;  %v597_v58 = vmax.f32 %v533_v19, 0.0 }
 0x146   : > { %v575_v25 = vadd.f32 %v574_v10, %v1250_v14  ;;  %v613_v45 = vmax.f32 %v573_v32, 0.0  ;;  %v610_v14 = vmax.f32 %v565_v34, 0.0  ;;  %v629_v10 = vpack.c.bf16 %v609_v4, %v607_v8 }
 0x147   : > { %v578_v22 = vpop.f32.mrf.mxu0 }
 0x148   : > { %v579_v28 = vadd.f32 %v578_v22, %v1244_v11  ;;  %v614_v35 = vmax.f32 %v575_v25, 0.0  ;;  %v631_v6 = vpack.c.bf16 %v613_v45, %v611_v49  ;;  %v630_v7 = vpack.c.bf16 %v610_v14, %v608_v51 }
 0x149   : > { %v580_v23 = vpop.f32.mrf.mxu0  ;;  %v626_v25 = vpack.c.bf16 %v602_v1, %v600_v59 }
 0x14a   : > { %v581_v26 = vadd.f32 %v580_v23, %v1244_v11  ;;  %v615_v40 = vmax.f32 %v579_v28, 0.0  ;;  %v632_v47 = vpack.c.bf16 %v614_v35, %v612_v43 }
 0x14b   : > { %v582_v24 = vpop.f32.mrf.mxu0 }
 0x14c   : > { %v583_v27 = vadd.f32 %v582_v24, %v1248_v13  ;;  %v616_v36 = vmax.f32 %v581_v26, 0.0  ;;  %v599_v26 = vmax.f32 %v539_v61, 0.0 }
 0x14d   : > { %v584_v29 = vpop.f32.mrf.mxu0 }
 0x14e   : > { %v585_v31 = vadd.f32 %v584_v29, %v1248_v13  ;;  %v617_v33 = vmax.f32 %v583_v27, 0.0  ;;  %v555_v13 = vadd.f32 %v554_v2, %v1258_v0  ;;  %v549_v2 = vadd.f32 %v548_v62, %v1256_v17 }
 0x14f   : > { %v535_v0 = vadd.f32 %v1282_v57, %v1266_v21  ;;  %v531_v17 = vadd.f32 %v1276_v54, %v1264_v20  ;;  %v529_v57 = vadd.f32 %v1272_v50, %v1264_v20  ;;  %v625_v27 = vpack.c.bf16 %v601_v60, %v599_v26  ;;  %v296_v20 = vld [vmem:[%s1372_s3] sm:$0x3] }
 0x150   : > { %v618_v37 = vmax.f32 %v585_v31, 0.0  ;;  %v633_v46 = vpack.c.bf16 %v617_v33, %v615_v40  ;;  %v606_v5 = vmax.f32 %v555_v13, 0.0  ;;  %v603_v23 = vmax.f32 %v549_v2, 0.0 }
 0x151   : > { %v598_v24 = vmax.f32 %v535_v0, 0.0  ;;  %v596_v18 = vmax.f32 %v531_v17, 0.0  ;;  %v595_v28 = vmax.f32 %v529_v57, 0.0 }
 0x152   : > { %v634_v11 = vpack.c.bf16 %v618_v37, %v616_v36  ;;  %v628_v22 = vpack.c.bf16 %v606_v5, %v604_v3  ;;  %v627_v62 = vpack.c.bf16 %v605_v9, %v603_v23 }
 0x153   : > { %v624_v54 = vpack.c.bf16 %v598_v24, %v596_v18  ;;  %v623_v21 = vpack.c.bf16 %v597_v58, %v595_v28 }
 0x154   : > { %640 = vmatprep.subr.bf16.mxu1 %v634_v11 }
 0x155   : > { %641 = vmatpush1.bf16.msra.mxu1 %v633_v46 }
 0x156   : > { %642 = vmatprep.subr.bf16.mxu1 %v632_v47 }
 0x159   : > { %643 = vmatpush1.bf16.msra.mxu1 %v631_v6 }
 0x15a   : > { %644 = vmatprep.subr.bf16.mxu1 %v630_v7 }
 0x15d   : > { %645 = vmatpush1.bf16.msra.mxu1 %v629_v10 }
 0x15e   : > { %646 = vmatprep.subr.bf16.mxu1 %v628_v22 }
 0x161   : > { %647 = vmatpush1.bf16.msra.mxu1 %v627_v62 }
 0x162   : > { %648 = vmatprep.subr.bf16.mxu1 %v626_v25 }
 0x165   : > { %649 = vmatpush1.bf16.msra.mxu1 %v625_v27 }
 0x166   : > { %650 = vmatprep.subr.bf16.mxu1 %v624_v54 }
 0x169   : > { %651 = vmatpush1.bf16.msra.mxu1 %v623_v21 }
 0x16a   : > { %652 = vmatprep.subr.bf16.mxu1 %v1278_v55 }
 0x16d   : > { %653 = vmatpush1.bf16.msra.mxu1 %v1274_v52 }
 0x16e   : > { %654 = vmatprep.subr.bf16.mxu1 %v1270_v41 }
 0x171   : > { %655 = vmatpush1.bf16.msra.mxu1 %v1268_v38 }
 0x174   : > { %673 = vmatmul.mubr.bf16.vlgmr.msra.gmra.mxu1 %v296_v20 }
 0x234   : > { %v674_v50 = vpop.f32.mrf.mxu1 }
 0x235   : > { %v675_v55 = vadd.f32 %v674_v50, %v638_v56 }
 0x236   : > { %v676_v29 = vpop.f32.mrf.mxu1 }
 0x237   : > { %v677_v52 = vadd.f32 %v676_v29, %v638_v56 }
 0x238   : > { %v678_v30 = vpop.f32.mrf.mxu1 }
 0x239   : > { %v683_v41 = vcombine.low %v675_v55, %v677_v52 }
 0x23a   : > { %v679_v38 = vpop.f32.mrf.mxu1 }
 0x23b   : > { %685 = vst [vmem:[%s260_s13] sm:$0xff] %v683_v41 }
 0x23c   : > { %928 = shalt.err (!%p925_p6)
}
 0x23d   : > { %s929_s29 = scalar_lea.hbm %s1327_s17, 128  ;;  %s933_s28 = scalar_lea.hbm %s1374_s5, 256 }
 0x23e   : > { %p930_p7 = scmp.ne.s32.totalorder %s1327_s17, %s929_s29  ;;  %p934_p13 = scmp.lt.s32.totalorder %s1327_s17, %s1374_s5 }
 0x23f   : > { %p935_p2 = scmp.lt.s32.totalorder %s933_s28, %s929_s29 }
 0x240   : > { %p931_p10 = pnand %p930_p7, %p1083_p9 }
 0x241   : > { %p936_p8 = por %p935_p2, %p934_p13 }
 0x242   : > { %p932_p4 = pneg %p931_p10 }
 0x244   : > { %p937_p12 = pnand %p936_p8, %p932_p4 }
 0x246   : > { %940 = shalt.err (!%p937_p12)
}
 0x247   : > { %814 = dma.vmem_to_hbm [thread:$0]  (%p1083_p9), %s704_s30, 128, %s1327_s17, %s687_s24  }
 0x248 PF: > { %s715_s13 = sand.u32 1, %s975_s18   ;;  %p1380_p0 = scmp.ge.s32.totalorder %s995_s23, 2 }
 0x249   : > { %s716_s14 = scalar_lea.sflag [#allocation4], %s715_s13 }
 0x24a   : > { %p821_p1 = pnand %p1380_p0, %p1090_p11 }
 0x24c   : > { %p822_p3 = pneg %p821_p1 }
 0x24e   : > { %970 = dma.done.wait (%p822_p3), %s716_s14, 128  }
 0x24f   : > { %972 = vsyncadd (%p822_p3), %s716_s14, 4294967168  ;;  %s21_s23 = sadd.s32 1, %s995_s23   ;;  %s1381_s18 = smov %s979_s19 }
 0x250   : > { %p18_p5 = scmp.ge.s32.totalorder %s21_s23, 4   ;;  %s1382_s19 = smov %s983_s20 }
 0x251   : > { %s1383_s20 = smov %s1088_s7  ;;  %s1384_s21 = smov %s991_s22 }
 0x252   : > { %s1385_s22 = smov %s1387_s26  ;;  %20 = sbr.rel (!%p18_p5) target bundleno = 6 (0x6), region = 85 }
 0x257   :  { %721 = vsyncpa [#allocation3], 1 }
 0x258   :  { %723 = vsyncpa [#allocation3 + $0x1], 1 }
 0x259   :  { %724 = vsyncpa [#allocation4], 1 }
 0x25a   :  { %726 = vsyncpa [#allocation4 + $0x1], 1 }

// kernel: tpu_custom_call.1
= control target key start
LH: loop header
LB: loop body
LE: loop exit
PB: predicated region body
PF: predicated region fallthrough
CT: control target
= control target key end

     0   :  { %10 = vsyncpa [#allocation3], 0  ;;  %s1369_s0 = inlined_call_operand.hbm [shape: f32[2,128,256], index: 0, kind: input, shape index: {}]   ;;  %s1370_s1 = inlined_call_operand.vmem [shape: bf16[128,128], index: 1, kind: input, shape index: {}]   ;;  %s1371_s2 = inlined_call_operand.vmem [shape: f32[128,1], index: 2, kind: input, shape index: {}]   ;;  %s1372_s3 = inlined_call_operand.vmem [shape: bf16[4,128], index: 3, kind: input, shape index: {}]   ;;  %s1373_s4 = inlined_call_operand.vmem [shape: f32[4,1], index: 4, kind: input, shape index: {}]   ;;  %s1374_s5 = inlined_call_operand.hbm [shape: f32[2,4,256], index: 5, kind: output, shape index: {}]  }
   0x1   :  { %12 = vsyncpa [#allocation3 + $0x1], 0 }
   0x2   :  { %13 = vsyncpa [#allocation4], 0 }
   0x3   :  { %15 = vsyncpa [#allocation4 + $0x1], 0  ;;  %s1032_s18 = smov 0   ;;  %s1034_s19 = smov 0  }
   0x4   :  { %s1036_s20 = smov 0   ;;  %s1038_s21 = smov 0  }
   0x5   :  { %s1040_s22 = smov 0   ;;  %s1042_s23 = smov 0  }
   0x6 LB: > { %s787_s24 = sadd.s32 4294967295, %s995_s23   ;;  %s788_s25 = sadd.s32 4294967294, %s995_s23   ;;  %s995_s23 = sphi %s1042_s23, %s21_s23   ;;  %s991_s22 = sphi %s1040_s22, %s1385_s22   ;;  %s987_s21 = sphi %s1038_s21, %s1384_s21   ;;  %s983_s20 = sphi %s1036_s20, %s1383_s20   ;;  %s979_s19 = sphi %s1034_s19, %s1382_s19   ;;  %s975_s18 = sphi %s1032_s18, %s1381_s18  }
   0x7   : > { %s33_s26 = sadd.s32 1, %s991_s22  ;;  %s42_s27 = sadd.s32 1, %s983_s20 }
   0x8   : > { %p35_p0 = scmp.ge.s32.totalorder %s33_s26, 2  ;;  %p49_p1 = scmp.ne.s32.totalorder %s983_s20, %s979_s19 }
   0x9   : > { %p50_p2 = scmp.eq.s32.totalorder %s995_s23, 0  ;;  %p55_p3 = scmp.ne.s32.totalorder %s979_s19, %s975_s18 }
   0xa   : > { %s1387_s26 = smov (%p35_p0, %s33_s26), 0  ;;  %p56_p5 = scmp.eq.s32.totalorder %s787_s24, 0 }
   0xb   : > { %p1073_p4 = por %p50_p2, %p49_p1  ;;  %s37_s29 = ssub.s32 %s991_s22, %s1387_s26 }
   0xc   : > { %p165_p6 = scmp.eq.s32.totalorder %s787_s24, 1  ;;  %p40_p7 = scmp.eq.s32.totalorder %s37_s29, 0 }
   0xd   : > { %p1079_p8 = por %p56_p5, %p55_p3  ;;  %p171_p10 = scmp.eq.s32.totalorder %s788_s25, 1 }
   0xe   : > { %p1083_p9 = por %p165_p6, %p49_p1  ;;  %p824_p13 = scmp.lt.s32.totalorder %s995_s23, 2 }
   0xf   : > { %s1088_s7 = scalar_select %p40_p7, %s983_s20, %s42_s27  }
  0x10   : > { %p1090_p11 = por %p171_p10, %p55_p3  ;;  %s203_s9 = sand.u32 1, %s983_s20  }
  0x11   : > { %s791_s10 = sshll.u32 %s203_s9, 8  ;;  %s810_s11 = sshll.u32 %s991_s22, 12 }
  0x12   : > { %s215_s14 = scalar_lea.hbm %s1369_s0, %s810_s11  ;;  %s207_s15 = scalar_lea.vmem [#allocation2], %s791_s10 }
  0x13   : > { %s216_s16 = sshll.u32 %s207_s15, 4  ;;  %p1103_p0 = pnand %p824_p13, %p1073_p4  ;;  %s217_s16 = int_to_ptr.vmem [resolvable:$true] %s216_s16 }
  0x14   : > { %p794_p1 = scmp.ge.s32.totalorder %s995_s23, 1  ;;  %s204_s24 = scalar_lea.sflag [#allocation3], %s203_s9 }
  0x15   : > { %p889_p2 = pneg %p1103_p0  ;;  %s900_s25 = scalar_lea.vmem %s217_s16, 4096 }
  0x16   : > { %p901_p3 = scmp.ne.s32.totalorder %s217_s16, %s900_s25  ;;  %s997_s27 = smov [#allocation2]  }
  0x17   : > { %s905_s29 = sshll.u32 %s997_s27, 4  ;;  %s906_s29 = int_to_ptr.vmem [resolvable:$false] %s905_s29 }
  0x18   : > { %p903_p5 = pnand %p901_p3, %p889_p2  ;;  %s907_s10 = scalar_lea.vmem %s906_s29, 8192 }
  0x19   : > { %p908_p7 = scmp.lt.s32.totalorder %s217_s16, %s906_s29  ;;  %p909_p10 = scmp.lt.s32.totalorder %s907_s10, %s900_s25 }
  0x1a   : > { %p904_p6 = pneg %p903_p5 }
  0x1b   : > { %p910_p12 = por %p909_p10, %p908_p7 }
  0x1d   : > { %p911_p4 = pnand %p910_p12, %p904_p6 }
  0x1f   : > { %914 = shalt.err (!%p911_p4)
}
  0x20   : > { %s998_s28 = smov 256   ;;  %s999_s9 = smov 16  }
  0x21   : > { %819 = dma.hbm_to_vmem [thread:$0]  (!%p1103_p0), %s215_s14, 4096, %s217_s16, %s204_s24, %s998_s28, %s998_s28, %s999_s9  }
  0x22   : > { %p224_p13 = scmp.lt.s32.totalorder %s995_s23, 3 }
  0x24   : > { %p225_p2 = pnand %p794_p1, %p224_p13 }
  0x25   : > { %s1116_s11 = sand.u32 (!%p225_p2), 1, %s979_s19  }
  0x26   : > { %228 = sbr.rel (%p225_p2) target bundleno = 584 (0x248), region = 40  ;;  %s795_s12 = sshll.u32 (!%p225_p2), %s1116_s11, 8 }
  0x27   : > { %s231_s13 = scalar_lea.sflag (!%p225_p2), [#allocation3], %s1116_s11  ;;  %s1120_s15 = scalar_lea.vmem (!%p225_p2), [#allocation2], %s795_s12 }
  0x2b   : > { %966 = dma.done.wait (%p1079_p8), %s231_s13, 4096  }
  0x2c   : > { %968 = vsyncadd (%p1079_p8), %s231_s13, 4294963200  ;;  %v1000_v0 = vmov 0   ;;  %v327_v1 = vld [vmem:[%s1120_s15 + $0xe8] sm:$0xff]  ;;  %v329_v2 = vld [vmem:[%s1120_s15 + $0xf8] sm:$0xff]  ;;  %s796_s9 = sshll.u32 %s1116_s11, 3  ;;  %s811_s12 = sshll.u32 %s987_s21, 7 }
  0x2d   : > { %506 = vmatprep.mubr.bf16.mxu0 %v1000_v0  ;;  %877 = vset.pattern.permute.xlu0 %v1000_v0  ;;  %v326_v3 = vld [vmem:[%s1120_s15 + $0xe0] sm:$0xff]  ;;  %v345_v4 = vpack.c.bf16 %v329_v2, %v327_v1  ;;  %v328_v5 = vld [vmem:[%s1120_s15 + $0xf0] sm:$0xff]  ;;  %v323_v6 = vld [vmem:[%s1120_s15 + $0xc8] sm:$0xff]  ;;  %s260_s13 = scalar_lea.vmem [#allocation5], %s796_s9  ;;  %s1327_s17 = scalar_lea.hbm %s1374_s5, %s811_s12 }
  0x2e   : > { %878 = vset.pattern.permute.xlu1 %v1000_v0  ;;  %672 = vmatprep.mubr.bf16.mxu1 %v1000_v0  ;;  %v325_v7 = vld [vmem:[%s1120_s15 + $0xd8] sm:$0xff]  ;;  %v344_v8 = vpack.c.bf16 %v328_v5, %v326_v3  ;;  %v322_v10 = vld [vmem:[%s1120_s15 + $0xc0] sm:$0xff]  ;;  %v324_v11 = vld [vmem:[%s1120_s15 + $0xd0] sm:$0xff]  ;;  %s703_s30 = sshll.u32 %s260_s13, 4  ;;  %s687_s24 = scalar_lea.sflag [#allocation4], %s1116_s11  ;;  %s704_s30 = int_to_ptr.vmem [resolvable:$true] %s703_s30 }
  0x2f   : > { %v343_v9 = vpack.c.bf16 %v325_v7, %v323_v6  ;;  %v319_v12 = vld [vmem:[%s1120_s15 + $0xa8] sm:$0xff]  ;;  %474 = vmatprep.subr.bf16.mxu0 %v345_v4  ;;  %v321_v13 = vld [vmem:[%s1120_s15 + $0xb8] sm:$0xff]  ;;  %v342_v14 = vpack.c.bf16 %v324_v11, %v322_v10  ;;  %v318_v16 = vld [vmem:[%s1120_s15 + $0xa0] sm:$0xff]  ;;  %s1001_s21 = smov [#allocation5]  }
  0x30   : > { %475 = vmatpush1.bf16.msra.mxu0 %v344_v8  ;;  %v341_v15 = vpack.c.bf16 %v321_v13, %v319_v12  ;;  %v320_v17 = vld [vmem:[%s1120_s15 + $0xb0] sm:$0xff]  ;;  %v315_v18 = vld [vmem:[%s1120_s15 + $0x88] sm:$0xff]  ;;  %v317_v19 = vld [vmem:[%s1120_s15 + $0x98] sm:$0xff]  ;;  %s919_s25 = sshll.u32 %s1001_s21, 4  ;;  %s920_s25 = int_to_ptr.vmem [resolvable:$false] %s919_s25 }
  0x31   : > { %476 = vmatprep.subr.bf16.mxu0 %v343_v9  ;;  %v340_v20 = vpack.c.bf16 %v320_v17, %v318_v16  ;;  %v339_v21 = vpack.c.bf16 %v317_v19, %v315_v18  ;;  %v314_v22 = vld [vmem:[%s1120_s15 + $0x80] sm:$0xff]  ;;  %v316_v23 = vld [vmem:[%s1120_s15 + $0x90] sm:$0xff]  ;;  %v311_v24 = vld [vmem:[%s1120_s15 + $0x68] sm:$0xff]  ;;  %s921_s27 = scalar_lea.vmem %s920_s25, 256  ;;  %p922_p1 = scmp.lt.s32.totalorder %s704_s30, %s920_s25 }
  0x32   : > { %v313_v25 = vld [vmem:[%s1120_s15 + $0x78] sm:$0xff]  ;;  %v310_v26 = vld [vmem:[%s1120_s15 + $0x60] sm:$0xff]  ;;  %v338_v27 = vpack.c.bf16 %v316_v23, %v314_v22  ;;  %v312_v28 = vld [vmem:[%s1120_s15 + $0x70] sm:$0xff] }
  0x33   : > { %v337_v29 = vpack.c.bf16 %v313_v25, %v311_v24  ;;  %v307_v30 = vld [vmem:[%s1120_s15 + $0x48] sm:$0xff]  ;;  %v309_v31 = vld [vmem:[%s1120_s15 + $0x58] sm:$0xff]  ;;  %v306_v32 = vld [vmem:[%s1120_s15 + $0x40] sm:$0xff]  ;;  %v336_v33 = vpack.c.bf16 %v312_v28, %v310_v26 }
  0x34   : > { %477 = vmatpush1.bf16.msra.mxu0 %v342_v14  ;;  %v308_v34 = vld [vmem:[%s1120_s15 + $0x50] sm:$0xff]  ;;  %v335_v36 = vpack.c.bf16 %v309_v31, %v307_v30  ;;  %v303_v37 = vld [vmem:[%s1120_s15 + $0x28] sm:$0xff]  ;;  %v292_v38 = vld [vmem:[%s1371_s2 + $0x60] sm:$0xff] }
  0x35   : > { %478 = vmatprep.subr.bf16.mxu0 %v341_v15  ;;  %v294_v35 = vld [vmem:[%s1371_s2 + $0x70] sm:$0xff]  ;;  %v305_v39 = vld [vmem:[%s1120_s15 + $0x38] sm:$0xff]  ;;  %408 = vperm.xlu1 %878, %v292_v38   ;;  %v293_v41 = vld [vmem:[%s1371_s2 + $0x68] sm:$0xff]  ;;  %v334_v42 = vpack.c.bf16 %v308_v34, %v306_v32 }
  0x36   : > { %418 = vperm.xlu0 %877, %v294_v35   ;;  %v295_v40 = vld [vmem:[%s1371_s2 + $0x78] sm:$0xff]  ;;  %v333_v43 = vpack.c.bf16 %v305_v39, %v303_v37  ;;  %v302_v44 = vld [vmem:[%s1120_s15 + $0x20] sm:$0xff]  ;;  %v304_v45 = vld [vmem:[%s1120_s15 + $0x30] sm:$0xff] }
  0x37   : > { %v299_v46 = vld [vmem:[%s1120_s15 + $0x8] sm:$0xff]  ;;  %v301_v47 = vld [vmem:[%s1120_s15 + $0x18] sm:$0xff]  ;;  %v290_v48 = vld [vmem:[%s1371_s2 + $0x50] sm:$0xff]  ;;  %v332_v50 = vpack.c.bf16 %v304_v45, %v302_v44 }
  0x38   : > { %479 = vmatpush1.bf16.msra.mxu0 %v340_v20  ;;  %v291_v49 = vld [vmem:[%s1371_s2 + $0x58] sm:$0xff]  ;;  %v331_v51 = vpack.c.bf16 %v301_v47, %v299_v46  ;;  %v298_v52 = vld [vmem:[%s1120_s15] sm:$0xff]  ;;  %v300_v53 = vld [vmem:[%s1120_s15 + $0x10] sm:$0xff]  ;;  %s915_s15 = scalar_lea.vmem %s704_s30, 128 }
  0x39   : > { %480 = vmatprep.subr.bf16.mxu0 %v339_v21  ;;  %413 = vperm.xlu1 %878, %v293_v41   ;;  %v288_v54 = vld [vmem:[%s1371_s2 + $0x40] sm:$0xff]  ;;  %v289_v55 = vld [vmem:[%s1371_s2 + $0x48] sm:$0xff]  ;;  %v330_v56 = vpack.c.bf16 %v300_v53, %v298_v52  ;;  %v286_v57 = vld [vmem:[%s1371_s2 + $0x30] sm:$0xff]  ;;  %p916_p8 = scmp.ne.s32.totalorder %s704_s30, %s915_s15  ;;  %p923_p3 = scmp.lt.s32.totalorder %s921_s27, %s915_s15 }
  0x3a   : > { %423 = vperm.xlu0 %877, %v295_v40   ;;  %v879_v58 = vld [vmem:[%s1370_s1] sm:$0xff]   ;;  %v287_v59 = vld [vmem:[%s1371_s2 + $0x38] sm:$0xff]  ;;  %v285_v61 = vld [vmem:[%s1371_s2 + $0x28] sm:$0xff] }
  0x3b   : > { %v284_v60 = vld [vmem:[%s1371_s2 + $0x20] sm:$0xff]  ;;  %v282_v62 = vld [vmem:[%s1371_s2 + $0x10] sm:$0xff]  ;;  %v880_v63 = vld [vmem:[%s1370_s1 + $0x8] sm:$0xff]   ;;  %p917_p12 = pnand %p916_p8, %p1083_p9  ;;  %p924_p5 = por %p923_p3, %p922_p1 }
  0x3c   : > { %481 = vmatpush1.bf16.msra.mxu0 %v338_v27  ;;  %v283_v1 = vld [vmem:[%s1371_s2 + $0x18] sm:$0xff]  ;;  %v280_v2 = vld [vmem:[%s1371_s2] sm:$0xff]  ;;  %v281_v3 = vld [vmem:[%s1371_s2 + $0x8] sm:$0xff] }
  0x3d   : > { %482 = vmatprep.subr.bf16.mxu0 %v337_v29  ;;  %403 = vperm.xlu1 %878, %v291_v49   ;;  %v297_v4 = vld [vmem:[%s1373_s4] sm:$0xf]  ;;  %v881_v5 = vld [vmem:[%s1370_s1 + $0x10] sm:$0xff]   ;;  %v882_v6 = vld [vmem:[%s1370_s1 + $0x18] sm:$0xff]   ;;  %p918_p0 = pneg %p917_p12 }
  0x3e   : > { %398 = vperm.xlu0 %877, %v290_v48   ;;  %v883_v7 = vld [vmem:[%s1370_s1 + $0x20] sm:$0xff]   ;;  %v884_v8 = vld [vmem:[%s1370_s1 + $0x28] sm:$0xff]   ;;  %v885_v9 = vld [vmem:[%s1370_s1 + $0x30] sm:$0xff]  }
  0x3f   : > { %v886_v10 = vld [vmem:[%s1370_s1 + $0x38] sm:$0xff]   ;;  %p925_p6 = pnand %p924_p5, %p918_p0 }
  0x40   : > { %483 = vmatpush1.bf16.msra.mxu0 %v336_v33 }
  0x41   : > { %484 = vmatprep.subr.bf16.mxu0 %v335_v36  ;;  %393 = vperm.xlu1 %878, %v289_v55  }
  0x42   : > { %388 = vperm.xlu0 %877, %v288_v54  }
  0x44   : > { %485 = vmatpush1.bf16.msra.mxu0 %v334_v42 }
  0x45   : > { %486 = vmatprep.subr.bf16.mxu0 %v333_v43  ;;  %383 = vperm.xlu1 %878, %v287_v59  }
  0x46   : > { %378 = vperm.xlu0 %877, %v286_v57  }
  0x48   : > { %487 = vmatpush1.bf16.msra.mxu0 %v332_v50 }
  0x49   : > { %488 = vmatprep.subr.bf16.mxu0 %v331_v51  ;;  %373 = vperm.xlu1 %878, %v285_v61  }
  0x4a   : > { %368 = vperm.xlu0 %877, %v284_v60  }
  0x4c   : > { %489 = vmatpush1.bf16.msra.mxu0 %v330_v56 }
  0x4d   : > { %363 = vperm.xlu1 %878, %v283_v1  }
  0x4e   : > { %358 = vperm.xlu0 %877, %v282_v62  }
  0x4f   : > { %507 = vmatmul.mubr.bf16.vlgmr.msra.gmra.mxu0 %v879_v58 }
  0x50   : > { %516 = vmatprep.mubr.bf16.mxu0 %v1000_v0 }
  0x51   : > { %353 = vperm.xlu1 %878, %v281_v3  }
  0x52   : > { %348 = vperm.xlu0 %877, %v280_v2  }
  0x56   : > { %637 = vperm.xlu0 %877, %v297_v4  }
  0x57   : > { %517 = vmatmul.mubr.bf16.gmra.mxu0 %v880_v63 }
  0x58   : > { %526 = vmatprep.mubr.bf16.mxu0 %v1000_v0 }
  0x5f   : > { %527 = vmatmul.mubr.bf16.gmra.mxu0 %v881_v5 }
  0x60   : > { %536 = vmatprep.mubr.bf16.mxu0 %v1000_v0 }
  0x67   : > { %537 = vmatmul.mubr.bf16.gmra.mxu0 %v882_v6 }
  0x68   : > { %546 = vmatprep.mubr.bf16.mxu0 %v1000_v0 }
  0x6f   : > { %547 = vmatmul.mubr.bf16.gmra.mxu0 %v883_v7 }
  0x70   : > { %556 = vmatprep.mubr.bf16.mxu0 %v1000_v0 }
  0x77   : > { %557 = vmatmul.mubr.bf16.gmra.mxu0 %v884_v8 }
  0x78   : > { %566 = vmatprep.mubr.bf16.mxu0 %v1000_v0 }
  0x7f   : > { %567 = vmatmul.mubr.bf16.gmra.mxu0 %v885_v9 }
  0x80   : > { %576 = vmatprep.mubr.bf16.mxu0 %v1000_v0 }
  0x87   : > { %577 = vmatmul.mubr.bf16.gmra.mxu0 %v886_v10 }
  0xb0   : > { %v1246_v12 = vpop.permute.xlu1 %408 }
  0xb1   : > { %v1244_v11 = vpop.permute.xlu0 %418 }
  0xb4   : > { %v1250_v14 = vpop.permute.xlu1 %413 }
  0xb5   : > { %v1248_v13 = vpop.permute.xlu0 %423 }
  0xb8   : > { %v1254_v16 = vpop.permute.xlu1 %403 }
  0xb9   : > { %v1252_v15 = vpop.permute.xlu0 %398 }
  0xbc   : > { %v1258_v0 = vpop.permute.xlu1 %393 }
  0xbd   : > { %v1256_v17 = vpop.permute.xlu0 %388 }
  0xc0   : > { %v1262_v19 = vpop.permute.xlu1 %383 }
  0xc1   : > { %v1260_v18 = vpop.permute.xlu0 %378 }
  0xc4   : > { %v1266_v21 = vpop.permute.xlu1 %373 }
  0xc5   : > { %v1264_v20 = vpop.permute.xlu0 %368 }
  0xc8   : > { %v364_v23 = vpop.permute.xlu1 %363 }
  0xc9   : > { %v359_v22 = vpop.permute.xlu0 %358 }
  0xcc   : > { %v354_v27 = vpop.permute.xlu1 %353 }
  0xcd   : > { %v349_v24 = vpop.permute.xlu0 %348 }
 0x10f   : > { %v508_v25 = vpop.f32.mrf.mxu0 }
 0x110   : > { %v509_v28 = vadd.f32 %v508_v25, %v349_v24 }
 0x111   : > { %v510_v26 = vpop.f32.mrf.mxu0 }
 0x112   : > { %v511_v30 = vadd.f32 %v510_v26, %v349_v24  ;;  %v587_v33 = vmax.f32 %v509_v28, 0.0 }
 0x113   : > { %v512_v29 = vpop.f32.mrf.mxu0 }
 0x114   : > { %v513_v31 = vadd.f32 %v512_v29, %v354_v27  ;;  %v588_v37 = vmax.f32 %v511_v30, 0.0 }
 0x115   : > { %v514_v32 = vpop.f32.mrf.mxu0 }
 0x116   : > { %v589_v34 = vmax.f32 %v513_v31, 0.0  ;;  %v515_v35 = vadd.f32 %v514_v32, %v354_v27 }
 0x117   : > { %v518_v36 = vpop.f32.mrf.mxu0 }
 0x118   : > { %v1268_v38 = vpack.c.bf16 %v589_v34, %v587_v33  ;;  %v590_v39 = vmax.f32 %v515_v35, 0.0  ;;  %v519_v42 = vadd.f32 %v518_v36, %v359_v22 }
 0x119   : > { %v520_v40 = vpop.f32.mrf.mxu0 }
 0x11a   : > { %v1270_v41 = vpack.c.bf16 %v590_v39, %v588_v37  ;;  %v521_v44 = vadd.f32 %v520_v40, %v359_v22  ;;  %v591_v47 = vmax.f32 %v519_v42, 0.0 }
 0x11b   : > { %v522_v43 = vpop.f32.mrf.mxu0 }
 0x11c   : > { %v523_v45 = vadd.f32 %v522_v43, %v364_v23  ;;  %v592_v51 = vmax.f32 %v521_v44, 0.0 }
 0x11d   : > { %v524_v46 = vpop.f32.mrf.mxu0 }
 0x11e   : > { %v593_v48 = vmax.f32 %v523_v45, 0.0  ;;  %v525_v49 = vadd.f32 %v524_v46, %v364_v23 }
 0x11f   : > { %v1272_v50 = vpop.f32.mrf.mxu0 }
 0x120   : > { %v1274_v52 = vpack.c.bf16 %v593_v48, %v591_v47  ;;  %v594_v53 = vmax.f32 %v525_v49, 0.0 }
 0x121   : > { %v1276_v54 = vpop.f32.mrf.mxu0 }
 0x122   : > { %v1278_v55 = vpack.c.bf16 %v594_v53, %v592_v51 }
 0x123   : > { %v1280_v56 = vpop.f32.mrf.mxu0 }
 0x125   : > { %v1282_v57 = vpop.f32.mrf.mxu0 }
 0x127   : > { %v1284_v58 = vpop.f32.mrf.mxu0 }
 0x129   : > { %v540_v59 = vpop.f32.mrf.mxu0 }
 0x12b   : > { %v542_v60 = vpop.f32.mrf.mxu0 }
 0x12d   : > { %v544_v61 = vpop.f32.mrf.mxu0 }
 0x12f   : > { %v548_v62 = vpop.f32.mrf.mxu0 }
 0x131   : > { %v550_v63 = vpop.f32.mrf.mxu0 }
 0x133   : > { %v552_v1 = vpop.f32.mrf.mxu0 }
 0x134   : > { %v553_v53 = vadd.f32 %v552_v1, %v1258_v0 }
 0x135   : > { %v554_v2 = vpop.f32.mrf.mxu0 }
 0x137   : > { %v558_v3 = vpop.f32.mrf.mxu0 }
 0x138   : > { %v559_v48 = vadd.f32 %v558_v3, %v1252_v15 }
 0x139   : > { %v560_v4 = vpop.f32.mrf.mxu0 }
 0x13a   : > { %v561_v42 = vadd.f32 %v560_v4, %v1252_v15  ;;  %v541_v15 = vadd.f32 %v540_v59, %v1260_v18 }
 0x13b   : > { %v562_v5 = vpop.f32.mrf.mxu0 }
 0x13c   : > { %v563_v44 = vadd.f32 %v562_v5, %v1254_v16  ;;  %v608_v51 = vmax.f32 %v561_v42, 0.0  ;;  %v600_v59 = vmax.f32 %v541_v15, 0.0 }
 0x13d   : > { %v564_v6 = vpop.f32.mrf.mxu0 }
 0x13e   : > { %v565_v34 = vadd.f32 %v564_v6, %v1254_v16  ;;  %v609_v4 = vmax.f32 %v563_v44, 0.0  ;;  %v545_v16 = vadd.f32 %v544_v61, %v1262_v19  ;;  %v539_v61 = vadd.f32 %v1284_v58, %v1260_v18 }
 0x13f   : > { %v568_v7 = vpop.f32.mrf.mxu0 }
 0x140   : > { %v569_v39 = vadd.f32 %v568_v7, %v1246_v12  ;;  %v602_v1 = vmax.f32 %v545_v16, 0.0 }
 0x141   : > { %v570_v8 = vpop.f32.mrf.mxu0 }
 0x142   : > { %v571_v30 = vadd.f32 %v570_v8, %v1246_v12  ;;  %v611_v49 = vmax.f32 %v569_v39, 0.0  ;;  %v551_v12 = vadd.f32 %v550_v63, %v1256_v17  ;;  %v607_v8 = vmax.f32 %v559_v48, 0.0 }
 0x143   : > { %v572_v9 = vpop.f32.mrf.mxu0  ;;  %v543_v63 = vadd.f32 %v542_v60, %v1262_v19  ;;  %v533_v19 = vadd.f32 %v1280_v56, %v1266_v21  ;;  %v638_v56 = vpop.permute.xlu0 %637 }
 0x144   : > { %v573_v32 = vadd.f32 %v572_v9, %v1250_v14  ;;  %v612_v43 = vmax.f32 %v571_v30, 0.0  ;;  %v604_v3 = vmax.f32 %v551_v12, 0.0  ;;  %v605_v9 = vmax.f32 %v553_v53, 0.0 }
 0x145   : > { %v574_v10 = vpop.f32.mrf.mxu0  ;;  %v601_v60 = vmax.f32 %v543_v63, 0.0  ;;  %v597_v58 = vmax.f32 %v533_v19, 0.0 }
 0x146   : > { %v575_v25 = vadd.f32 %v574_v10, %v1250_v14  ;;  %v613_v45 = vmax.f32 %v573_v32, 0.0  ;;  %v610_v14 = vmax.f32 %v565_v34, 0.0  ;;  %v629_v10 = vpack.c.bf16 %v609_v4, %v607_v8 }
 0x147   : > { %v578_v22 = vpop.f32.mrf.mxu0 }
 0x148   : > { %v579_v28 = vadd.f32 %v578_v22, %v1244_v11  ;;  %v614_v35 = vmax.f32 %v575_v25, 0.0  ;;  %v631_v6 = vpack.c.bf16 %v613_v45, %v611_v49  ;;  %v630_v7 = vpack.c.bf16 %v610_v14, %v608_v51 }
 0x149   : > { %v580_v23 = vpop.f32.mrf.mxu0  ;;  %v626_v25 = vpack.c.bf16 %v602_v1, %v600_v59 }
 0x14a   : > { %v581_v26 = vadd.f32 %v580_v23, %v1244_v11  ;;  %v615_v40 = vmax.f32 %v579_v28, 0.0  ;;  %v632_v47 = vpack.c.bf16 %v614_v35, %v612_v43 }
 0x14b   : > { %v582_v24 = vpop.f32.mrf.mxu0 }
 0x14c   : > { %v583_v27 = vadd.f32 %v582_v24, %v1248_v13  ;;  %v616_v36 = vmax.f32 %v581_v26, 0.0  ;;  %v599_v26 = vmax.f32 %v539_v61, 0.0 }
 0x14d   : > { %v584_v29 = vpop.f32.mrf.mxu0 }
 0x14e   : > { %v585_v31 = vadd.f32 %v584_v29, %v1248_v13  ;;  %v617_v33 = vmax.f32 %v583_v27, 0.0  ;;  %v555_v13 = vadd.f32 %v554_v2, %v1258_v0  ;;  %v549_v2 = vadd.f32 %v548_v62, %v1256_v17 }
 0x14f   : > { %v535_v0 = vadd.f32 %v1282_v57, %v1266_v21  ;;  %v531_v17 = vadd.f32 %v1276_v54, %v1264_v20  ;;  %v529_v57 = vadd.f32 %v1272_v50, %v1264_v20  ;;  %v625_v27 = vpack.c.bf16 %v601_v60, %v599_v26  ;;  %v296_v20 = vld [vmem:[%s1372_s3] sm:$0x3] }
 0x150   : > { %v618_v37 = vmax.f32 %v585_v31, 0.0  ;;  %v633_v46 = vpack.c.bf16 %v617_v33, %v615_v40  ;;  %v606_v5 = vmax.f32 %v555_v13, 0.0  ;;  %v603_v23 = vmax.f32 %v549_v2, 0.0 }
 0x151   : > { %v598_v24 = vmax.f32 %v535_v0, 0.0  ;;  %v596_v18 = vmax.f32 %v531_v17, 0.0  ;;  %v595_v28 = vmax.f32 %v529_v57, 0.0 }
 0x152   : > { %v634_v11 = vpack.c.bf16 %v618_v37, %v616_v36  ;;  %v628_v22 = vpack.c.bf16 %v606_v5, %v604_v3  ;;  %v627_v62 = vpack.c.bf16 %v605_v9, %v603_v23 }
 0x153   : > { %v624_v54 = vpack.c.bf16 %v598_v24, %v596_v18  ;;  %v623_v21 = vpack.c.bf16 %v597_v58, %v595_v28 }
 0x154   : > { %640 = vmatprep.subr.bf16.mxu1 %v634_v11 }
 0x155   : > { %641 = vmatpush1.bf16.msra.mxu1 %v633_v46 }
 0x156   : > { %642 = vmatprep.subr.bf16.mxu1 %v632_v47 }
 0x159   : > { %643 = vmatpush1.bf16.msra.mxu1 %v631_v6 }
 0x15a   : > { %644 = vmatprep.subr.bf16.mxu1 %v630_v7 }
 0x15d   : > { %645 = vmatpush1.bf16.msra.mxu1 %v629_v10 }
 0x15e   : > { %646 = vmatprep.subr.bf16.mxu1 %v628_v22 }
 0x161   : > { %647 = vmatpush1.bf16.msra.mxu1 %v627_v62 }
 0x162   : > { %648 = vmatprep.subr.bf16.mxu1 %v626_v25 }
 0x165   : > { %649 = vmatpush1.bf16.msra.mxu1 %v625_v27 }
 0x166   : > { %650 = vmatprep.subr.bf16.mxu1 %v624_v54 }
 0x169   : > { %651 = vmatpush1.bf16.msra.mxu1 %v623_v21 }
 0x16a   : > { %652 = vmatprep.subr.bf16.mxu1 %v1278_v55 }
 0x16d   : > { %653 = vmatpush1.bf16.msra.mxu1 %v1274_v52 }
 0x16e   : > { %654 = vmatprep.subr.bf16.mxu1 %v1270_v41 }
 0x171   : > { %655 = vmatpush1.bf16.msra.mxu1 %v1268_v38 }
 0x174   : > { %673 = vmatmul.mubr.bf16.vlgmr.msra.gmra.mxu1 %v296_v20 }
 0x234   : > { %v674_v50 = vpop.f32.mrf.mxu1 }
 0x235   : > { %v675_v55 = vadd.f32 %v674_v50, %v638_v56 }
 0x236   : > { %v676_v29 = vpop.f32.mrf.mxu1 }
 0x237   : > { %v677_v52 = vadd.f32 %v676_v29, %v638_v56 }
 0x238   : > { %v678_v30 = vpop.f32.mrf.mxu1 }
 0x239   : > { %v683_v41 = vcombine.low %v675_v55, %v677_v52 }
 0x23a   : > { %v679_v38 = vpop.f32.mrf.mxu1 }
 0x23b   : > { %685 = vst [vmem:[%s260_s13] sm:$0xff] %v683_v41 }
 0x23c   : > { %928 = shalt.err (!%p925_p6)
}
 0x23d   : > { %s929_s29 = scalar_lea.hbm %s1327_s17, 128  ;;  %s933_s28 = scalar_lea.hbm %s1374_s5, 256 }
 0x23e   : > { %p930_p7 = scmp.ne.s32.totalorder %s1327_s17, %s929_s29  ;;  %p934_p13 = scmp.lt.s32.totalorder %s1327_s17, %s1374_s5 }
 0x23f   : > { %p935_p2 = scmp.lt.s32.totalorder %s933_s28, %s929_s29 }
 0x240   : > { %p931_p10 = pnand %p930_p7, %p1083_p9 }
 0x241   : > { %p936_p8 = por %p935_p2, %p934_p13 }
 0x242   : > { %p932_p4 = pneg %p931_p10 }
 0x244   : > { %p937_p12 = pnand %p936_p8, %p932_p4 }
 0x246   : > { %940 = shalt.err (!%p937_p12)
}
 0x247   : > { %814 = dma.vmem_to_hbm [thread:$0]  (%p1083_p9), %s704_s30, 128, %s1327_s17, %s687_s24  }
 0x248 PF: > { %s715_s13 = sand.u32 1, %s975_s18   ;;  %p1380_p0 = scmp.ge.s32.totalorder %s995_s23, 2 }
 0x249   : > { %s716_s14 = scalar_lea.sflag [#allocation4], %s715_s13 }
 0x24a   : > { %p821_p1 = pnand %p1380_p0, %p1090_p11 }
 0x24c   : > { %p822_p3 = pneg %p821_p1 }
 0x24e   : > { %970 = dma.done.wait (%p822_p3), %s716_s14, 128  }
 0x24f   : > { %972 = vsyncadd (%p822_p3), %s716_s14, 4294967168  ;;  %s21_s23 = sadd.s32 1, %s995_s23   ;;  %s1381_s18 = smov %s979_s19 }
 0x250   : > { %p18_p5 = scmp.ge.s32.totalorder %s21_s23, 4   ;;  %s1382_s19 = smov %s983_s20 }
 0x251   : > { %s1383_s20 = smov %s1088_s7  ;;  %s1384_s21 = smov %s991_s22 }
 0x252   : > { %s1385_s22 = smov %s1387_s26  ;;  %20 = sbr.rel (!%p18_p5) target bundleno = 6 (0x6), region = 85 }
 0x257   :  { %721 = vsyncpa [#allocation3], 1 }
 0x258   :  { %723 = vsyncpa [#allocation3 + $0x1], 1 }
 0x259   :  { %724 = vsyncpa [#allocation4], 1 }
 0x25a   :  { %726 = vsyncpa [#allocation4 + $0x1], 1 }

</bundles_post_ra>
